<compile_context>
chip_gen: v7x
topology: tpu7x:2x2x1
jax: 0.10.0
libtpu: 0.0.40
codegen_flags: <defaults>
</compile_context>

<pallas_src>
import functools

import jax
import jax.numpy as jnp
import numpy as np
from jax.experimental import pallas as pl
from jax.experimental.pallas import tpu as pltpu

LANES = 128                    # lane width (last-dim tile)
MAX_TILE_ROWS = 4096           # 4096*128*4B = 2 MiB per f32 operand per buffer
ROW_ALIGN = 32                 # 32-row tiles keep the int8 mask block layout-legal
VMEM_LIMIT_BYTES = 32 * 1024 * 1024   # raise v5e's 16 MiB default; <= physical everywhere


def _bce_with_logits(x, y):
    # Numerically stable BCE with logits, same formulation PyTorch uses:
    #   max(x, 0) - x*y + log(1 + exp(-|x|))
    return jnp.maximum(x, 0.0) - x * y + jnp.log1p(jnp.exp(-jnp.abs(x)))


def _row_valid(shape, tile_rows, n_valid_rows):
    """Row-validity mask for the (only possible) partial last tile.

    Pure row compare (no flat int32 index) -> no overflow for huge tensors,
    ~2 VPU ops/elem, and it is only emitted when a partial tile exists.
    """
    rows = jax.lax.broadcasted_iota(jnp.int32, shape, 0)
    return (pl.program_id(0) * tile_rows + rows) < n_valid_rows


# ---------------- elementwise kernels (reduction='none' path) ----------------

def _elem_kernel(x_ref, y_ref, out_ref):
    x = x_ref[...].astype(jnp.float32)
    y = y_ref[...].astype(jnp.float32)
    out_ref[...] = _bce_with_logits(x, y).astype(out_ref.dtype)


def _elem_masked_kernel(x_ref, y_ref, m_ref, out_ref):
    x = x_ref[...].astype(jnp.float32)
    y = y_ref[...].astype(jnp.float32)
    m = m_ref[...].astype(jnp.float32)
    out_ref[...] = (_bce_with_logits(x, y) * m).astype(out_ref.dtype)


# ----------- mean kernels (per-tile partial sums; grid axis parallel) --------

def _mean_kernel(x_ref, y_ref, lpart_ref, *, tile_rows, n_valid_rows):
    x = x_ref[...].astype(jnp.float32)
    y = y_ref[...].astype(jnp.float32)
    loss = _bce_with_logits(x, y)
    if n_valid_rows is not None:   # static: only when a partial last tile exists
        loss = jnp.where(_row_valid(x.shape, tile_rows, n_valid_rows), loss, 0.0)
    lpart_ref[...] = jnp.sum(loss, axis=0, keepdims=True)


def _mean_masked_kernel(x_ref, y_ref, m_ref, lpart_ref, mpart_ref, *,
                        tile_rows, n_valid_rows):
    x = x_ref[...].astype(jnp.float32)
    y = y_ref[...].astype(jnp.float32)
    m = m_ref[...].astype(jnp.float32)
    loss = _bce_with_logits(x, y) * m
    if n_valid_rows is not None:   # select() keeps OOB garbage (inf/nan) out of sums
        valid = _row_valid(x.shape, tile_rows, n_valid_rows)
        m = jnp.where(valid, m, 0.0)
        loss = jnp.where(valid, loss, 0.0)
    lpart_ref[...] = jnp.sum(loss, axis=0, keepdims=True)
    mpart_ref[...] = jnp.sum(m, axis=0, keepdims=True)


# --------------------------------- wrapper -----------------------------------

def _choose_tile_rows(R):
    """Biggest lane-dense block that fits VMEM, but >=2 tiles when feasible so
    dimension_semantics=('parallel',) keeps both v7x TensorCores busy."""
    if R <= 2 * ROW_ALIGN:
        return R                                     # tiny: single full-dim tile
    half = -(-R // 2)
    half = -(-half // ROW_ALIGN) * ROW_ALIGN         # round up to 32-row multiple
    return min(half, MAX_TILE_ROWS)


def masked_bce_with_logits_loss(inp, target, mask=None, return_mean=False):
    """JAX/Pallas equivalent of MaskedBCEWithLogitsLoss.forward."""
    orig_shape = inp.shape
    n = int(np.prod(orig_shape)) if orig_shape else 1
    out_dtype = inp.dtype if jnp.issubdtype(inp.dtype, jnp.floating) else jnp.float32

    x_flat = jnp.ravel(inp)
    y_flat = jnp.ravel(target)
    m_flat = jnp.ravel(mask) if mask is not None else None

    R = n // LANES              # rows in the lane-aligned prefix
    n_main = R * LANES
    tail = n - n_main           # < 128 ragged elements -> plain jnp, no full-array pad

    # ---- ragged tail (tiny; avoids padding/slicing the full arrays) ---------
    loss_tail = None
    mask_tail = None
    if tail:
        xt = x_flat[n_main:].astype(jnp.float32)
        yt = y_flat[n_main:].astype(jnp.float32)
        loss_tail = _bce_with_logits(xt, yt)
        if m_flat is not None:
            mask_tail = m_flat[n_main:].astype(jnp.float32)
            loss_tail = loss_tail * mask_tail

    if R == 0:
        # whole tensor smaller than one lane row -> no kernel launch needed
        if return_mean:
            if mask is not None:
                return jnp.sum(loss_tail) / jnp.sum(mask_tail)
            return jnp.sum(loss_tail) / jnp.float32(n)
        return loss_tail.astype(out_dtype).reshape(orig_shape)

    # ---- lane-aligned prefix through the Pallas kernel -----------------------
    def main2d(a):
        a = a if tail == 0 else a[:n_main]   # aligned case: metadata-only reshape
        return a.reshape(R, LANES)

    operands = [main2d(x_flat), main2d(y_flat)]
    if m_flat is not None:
        m_k = m_flat.astype(jnp.int8) if m_flat.dtype == jnp.bool_ else m_flat
        operands.append(main2d(m_k))         # keep mask traffic at native width

    tile_rows = _choose_tile_rows(R)
    num_tiles = -(-R // tile_rows)
    grid = (num_tiles,)
    # Row mask only needed if the tiling over-covers the prefix (partial last tile).
    n_valid_rows = None if num_tiles * tile_rows == R else R

    in_specs = [pl.BlockSpec((tile_rows, LANES), lambda i: (i, 0)) for _ in operands]
    cparams = pltpu.CompilerParams(dimension_semantics=("parallel",),
                                   vmem_limit_bytes=VMEM_LIMIT_BYTES)
    in_bytes = sum(int(np.prod(o.shape)) * o.dtype.itemsize for o in operands)

    if return_mean:
        # Per-tile partial sums written lane-dense into (1, num_tiles*128) and
        # reduced here. No loop-carried accumulator -> grid shards across TCs.
        part_shape = jax.ShapeDtypeStruct((1, num_tiles * LANES), jnp.float32)
        part_spec = pl.BlockSpec((1, LANES), lambda i: (0, i))
        cost = pl.CostEstimate(flops=5 * n_main, transcendentals=2 * n_main,
                               bytes_accessed=in_bytes + 4 * num_tiles * LANES)
        if mask is not None:
            kern = functools.partial(_mean_masked_kernel,
                                     tile_rows=tile_rows, n_valid_rows=n_valid_rows)
            lpart, mpart = pl.pallas_call(
                kern,
                out_shape=(part_shape, part_shape),
                grid_spec=pltpu.PrefetchScalarGridSpec(
                    num_scalar_prefetch=0, grid=grid,
                    in_specs=in_specs, out_specs=(part_spec, part_spec)),
                compiler_params=cparams,
                cost_estimate=cost,
            )(*operands)
            loss_sum = jnp.sum(lpart)
            mask_sum = jnp.sum(mpart)
            if tail:
                loss_sum = loss_sum + jnp.sum(loss_tail)
                mask_sum = mask_sum + jnp.sum(mask_tail)
            # NOTE: all-zero mask -> division yields inf/nan, matching PyTorch.
            return loss_sum / mask_sum
        else:
            kern = functools.partial(_mean_kernel,
                                     tile_rows=tile_rows, n_valid_rows=n_valid_rows)
            lpart = pl.pallas_call(
                kern,
                out_shape=part_shape,
                grid_spec=pltpu.PrefetchScalarGridSpec(
                    num_scalar_prefetch=0, grid=grid,
                    in_specs=in_specs, out_specs=part_spec),
                compiler_params=cparams,
                cost_estimate=cost,
            )(*operands)
            loss_sum = jnp.sum(lpart)
            if tail:
                loss_sum = loss_sum + jnp.sum(loss_tail)
            return loss_sum / jnp.float32(n)

    # reduction='none' path: elementwise (masked) loss in the original shape.
    out_spec = pl.BlockSpec((tile_rows, LANES), lambda i: (i, 0))
    kern = _elem_masked_kernel if mask is not None else _elem_kernel
    cost = pl.CostEstimate(flops=5 * n_main, transcendentals=2 * n_main,
                           bytes_accessed=in_bytes + n_main * jnp.dtype(out_dtype).itemsize)
    out2 = pl.pallas_call(
        kern,
        out_shape=jax.ShapeDtypeStruct((R, LANES), out_dtype),
        grid_spec=pltpu.PrefetchScalarGridSpec(
            num_scalar_prefetch=0, grid=grid,
            in_specs=in_specs, out_specs=out_spec),
        compiler_params=cparams,
        cost_estimate=cost,
    )(*operands)

    out = out2.reshape(-1)
    if tail:
        out = jnp.concatenate([out, loss_tail.astype(out_dtype)])
    return out.reshape(orig_shape)


if __name__ == "__main__":
    key = jax.random.PRNGKey(0)
    k1, k2, k3 = jax.random.split(key, 3)

    def ref_loss_fn(x, y):
        return jnp.maximum(x, 0.0) - x * y + jnp.log1p(jnp.exp(-jnp.abs(x)))

    # 1) lane-aligned 4-D shape -------------------------------------------------
    shape = (2, 4, 16, 16)
    logits = jax.random.normal(k1, shape, dtype=jnp.float32)
    target = (jax.random.uniform(k2, shape) > 0.5).astype(jnp.float32)
    mask = (jax.random.uniform(k3, shape) > 0.3).astype(jnp.float32)

    out_elem = masked_bce_with_logits_loss(logits, target, mask)
    out_elem_nomask = masked_bce_with_logits_loss(logits, target, None)
    out_mean = masked_bce_with_logits_loss(logits, target, mask, return_mean=True)
    out_mean_nomask = masked_bce_with_logits_loss(logits, target, None, return_mean=True)
    jax.block_until_ready((out_elem, out_elem_nomask, out_mean, out_mean_nomask))

    ref = ref_loss_fn(logits, target)
    assert out_elem.shape == shape and out_elem.dtype == jnp.float32
    assert jnp.allclose(out_elem, ref * mask, atol=1e-5, rtol=1e-5)
    assert jnp.allclose(out_elem_nomask, ref, atol=1e-5, rtol=1e-5)
    assert jnp.allclose(out_mean, (ref * mask).sum() / mask.sum(), atol=1e-5, rtol=1e-5)
    assert jnp.allclose(out_mean_nomask, ref.mean(), atol=1e-5, rtol=1e-5)

    # 2) non-128-aligned shape: kernel on the aligned prefix (2 tiles, partial
    #    last tile, bool->int8 mask) + jnp ragged tail --------------------------
    shape2 = (101, 127)   # n = 12827 -> 100 lane rows + 27-element tail
    l2 = jax.random.normal(k1, shape2, dtype=jnp.float32)
    t2 = (jax.random.uniform(k2, shape2) > 0.5).astype(jnp.float32)
    m2 = jax.random.uniform(k3, shape2) > 0.3            # bool mask
    ref2 = ref_loss_fn(l2, t2)
    got_elem2 = masked_bce_with_logits_loss(l2, t2, m2)
    got_mean2 = masked_bce_with_logits_loss(l2, t2, m2, return_mean=True)
    got_mean2_nm = masked_bce_with_logits_loss(l2, t2, None, return_mean=True)
    jax.block_until_ready((got_elem2, got_mean2, got_mean2_nm))
    m2f = m2.astype(jnp.float32)
    assert jnp.allclose(got_elem2, ref2 * m2f, atol=1e-5, rtol=1e-5)
    assert jnp.allclose(got_mean2, (ref2 * m2f).sum() / m2f.sum(), atol=1e-5, rtol=1e-5)
    assert jnp.allclose(got_mean2_nm, ref2.mean(), atol=1e-5, rtol=1e-5)

    # 3) tiny (< one lane row) shape: pure-jnp fallback path --------------------
    shape3 = (3, 5, 7)
    l3 = jax.random.normal(k1, shape3, dtype=jnp.float32)
    t3 = (jax.random.uniform(k2, shape3) > 0.5).astype(jnp.float32)
    m3 = (jax.random.uniform(k3, shape3) > 0.3).astype(jnp.float32)
    ref3 = ref_loss_fn(l3, t3)
    got_elem3 = masked_bce_with_logits_loss(l3, t3, m3)
    got_mean3 = masked_bce_with_logits_loss(l3, t3, m3, return_mean=True)
    jax.block_until_ready((got_elem3, got_mean3))
    assert jnp.allclose(got_elem3, ref3 * m3, atol=1e-5, rtol=1e-5)
    assert jnp.allclose(got_mean3, (ref3 * m3).sum() / m3.sum(), atol=1e-5, rtol=1e-5)

    print("KERNEL_OK")
</pallas_src>

<mosaic_0001>
module attributes {stable_mosaic.version = 11 : i64} {
  func.func @_elem_masked_kernel(%arg0: i32, %arg1: memref<16x128xf32, #tpu.memory_space<vmem>>, %arg2: memref<16x128xf32, #tpu.memory_space<vmem>>, %arg3: memref<16x128xf32, #tpu.memory_space<vmem>>, %arg4: memref<16x128xf32, #tpu.memory_space<vmem>>) attributes {dimension_semantics = [#tpu.dimension_semantics<parallel>], iteration_bounds = array<i64: 1>, scalar_prefetch = 0 : i64, scratch_operands = 0 : i64, tpu.core_type = #tpu.core_type<tc>, window_params = [{transform_indices = @transform_0, window_bounds = array<i64: 16, 128>}, {transform_indices = @transform_1, window_bounds = array<i64: 16, 128>}, {transform_indices = @transform_2, window_bounds = array<i64: 16, 128>}, {transform_indices = @transform_3, window_bounds = array<i64: 16, 128>}]} {
    %c0 = arith.constant 0 : index
    %c0_0 = arith.constant 0 : index
    %0 = vector.load %arg1[%c0, %c0_0] : memref<16x128xf32, #tpu.memory_space<vmem>>, vector<16x128xf32>
    %c0_1 = arith.constant 0 : index
    %c0_2 = arith.constant 0 : index
    %1 = vector.load %arg2[%c0_1, %c0_2] : memref<16x128xf32, #tpu.memory_space<vmem>>, vector<16x128xf32>
    %c0_3 = arith.constant 0 : index
    %c0_4 = arith.constant 0 : index
    %2 = vector.load %arg3[%c0_3, %c0_4] : memref<16x128xf32, #tpu.memory_space<vmem>>, vector<16x128xf32>
    %cst = arith.constant 0.000000e+00 : f32
    %3 = vector.broadcast %cst : f32 to vector<16x128xf32>
    %4 = arith.maximumf %0, %3 : vector<16x128xf32>
    %5 = arith.mulf %0, %1 : vector<16x128xf32>
    %6 = arith.subf %4, %5 : vector<16x128xf32>
    %7 = math.absf %0 : vector<16x128xf32>
    %cst_5 = arith.constant 0.000000e+00 : f32
    %8 = vector.broadcast %cst_5 : f32 to vector<16x128xf32>
    %9 = arith.subf %8, %7 : vector<16x128xf32>
    %10 = math.exp %9 : vector<16x128xf32>
    %11 = math.log1p %10 : vector<16x128xf32>
    %12 = arith.addf %6, %11 : vector<16x128xf32>
    %13 = arith.mulf %12, %2 : vector<16x128xf32>
    %c0_6 = arith.constant 0 : index
    %c0_7 = arith.constant 0 : index
    %14 = vector.load %arg4[%c0_6, %c0_7] : memref<16x128xf32, #tpu.memory_space<vmem>>, vector<16x128xf32>
    tpu.vector_store %arg4[%c0_6, %c0_7], %13 {strides = array<i32>} : memref<16x128xf32, #tpu.memory_space<vmem>>, vector<16x128xf32>,
    return
  }
  func.func @transform_0(%arg0: i32) -> (i32, i32) {
    %c0_i32 = arith.constant 0 : i32
    %c0_i32_0 = arith.constant 0 : i32
    return %arg0, %c0_i32 : i32, i32
  }
  func.func @transform_1(%arg0: i32) -> (i32, i32) {
    %c0_i32 = arith.constant 0 : i32
    %c0_i32_0 = arith.constant 0 : i32
    return %arg0, %c0_i32 : i32, i32
  }
  func.func @transform_2(%arg0: i32) -> (i32, i32) {
    %c0_i32 = arith.constant 0 : i32
    %c0_i32_0 = arith.constant 0 : i32
    return %arg0, %c0_i32 : i32, i32
  }
  func.func @transform_3(%arg0: i32) -> (i32, i32) {
    %c0_i32 = arith.constant 0 : i32
    %c0_i32_0 = arith.constant 0 : i32
    return %arg0, %c0_i32 : i32, i32
  }
}

</mosaic_0001>

<bundles_post_ra>
// kernel: tpu_custom_call.1
= control target key start
LH: loop header
LB: loop body
LE: loop exit
PB: predicated region body
PF: predicated region fallthrough
CT: control target
= control target key end

     0   :  { %8 = vsyncpa [#allocation3], 0  ;;  %s319_s0 = inlined_call_operand.hbm [shape: f32[16,128], index: 0, kind: input, shape index: {}]   ;;  %s320_s1 = inlined_call_operand.hbm [shape: f32[16,128], index: 1, kind: input, shape index: {}]   ;;  %s321_s2 = inlined_call_operand.hbm [shape: f32[16,128], index: 2, kind: input, shape index: {}]   ;;  %s322_s3 = inlined_call_operand.hbm [shape: f32[16,128], index: 3, kind: output, shape index: {}]  }
   0x1   :  { %9 = vsyncpa [#allocation6], 0 }
   0x2   :  { %10 = vsyncpa [#allocation4], 0  ;;  %s226_s12 = smov [#allocation5]   ;;  %s227_s14 = smov [#allocation2]  }
   0x3   :  { %s28_s13 = sshll.u32 %s226_s12, 4  ;;  %s16_s15 = sshll.u32 %s227_s14, 4  ;;  %s29_s13 = int_to_ptr.vmem [resolvable:$true] %s28_s13  ;;  %s252_s15 = int_to_ptr.vmem [resolvable:$true] %s16_s15 }
   0x4   :  { %s132_s18 = scalar_lea.hbm %s320_s1, 256 }
   0x5   :  { %p133_p0 = scmp.ne.s32.totalorder %s320_s1, %s132_s18  ;;  %p136_p1 = scmp.lt.u32.totalorder %s132_s18, %s320_s1 }
   0x7   :  { %p138_p2 = pnand %p136_p1, %p133_p0 }
   0x9   :  { %141 = shalt.err (!%p138_p2)
}
   0xa   :  { %s142_s23 = scalar_lea.vmem %s29_s13, 256  ;;  %p147_p4 = scmp.lt.s32.totalorder %s29_s13, %s29_s13 }
   0xb   :  { %p143_p3 = scmp.ne.s32.totalorder %s29_s13, %s142_s23  ;;  %p148_p5 = scmp.lt.s32.totalorder %s142_s23, %s142_s23 }
   0xd   :  { %p149_p6 = por %p148_p5, %p147_p4 }
   0xf   :  { %p150_p7 = pnand %p149_p6, %p143_p3 }
  0x11   :  { %153 = shalt.err (!%p150_p7)
}
  0x12   :  { %s228_s24 = smov 128   ;;  %s229_s25 = smov 8  }
  0x13   :  { %34 = dma.hbm_to_vmem [thread:$0]  %s320_s1, 256, %s29_s13, [#allocation6], %s228_s24, %s228_s24, %s229_s25  }
  0x14   :  { %s154_s30 = scalar_lea.hbm %s319_s0, 256 }
  0x15   :  { %p155_p8 = scmp.ne.s32.totalorder %s319_s0, %s154_s30  ;;  %p158_p9 = scmp.lt.u32.totalorder %s154_s30, %s319_s0 }
  0x17   :  { %p160_p10 = pnand %p158_p9, %p155_p8 }
  0x19   :  { %163 = shalt.err (!%p160_p10)
}
  0x1a   :  { %s164_s8 = scalar_lea.vmem %s252_s15, 256  ;;  %p169_p12 = scmp.lt.s32.totalorder %s252_s15, %s252_s15 }
  0x1b   :  { %p165_p11 = scmp.ne.s32.totalorder %s252_s15, %s164_s8  ;;  %p170_p13 = scmp.lt.s32.totalorder %s164_s8, %s164_s8 }
  0x1d   :  { %p171_p0 = por %p170_p13, %p169_p12 }
  0x1f   :  { %p172_p1 = pnand %p171_p0, %p165_p11 }
  0x21   :  { %175 = shalt.err (!%p172_p1)
}
  0x22   :  { %22 = dma.hbm_to_vmem [thread:$0]  %s319_s0, 256, %s252_s15, [#allocation3], %s228_s24, %s228_s24, %s229_s25  }
  0x23   :  { %s230_s10 = smov [#allocation7]   ;;  %s176_s14 = scalar_lea.hbm %s321_s2, 256 }
  0x24   :  { %s40_s11 = sshll.u32 %s230_s10, 4  ;;  %p177_p2 = scmp.ne.s32.totalorder %s321_s2, %s176_s14  ;;  %s41_s11 = int_to_ptr.vmem [resolvable:$true] %s40_s11 }
  0x25   :  { %p180_p3 = scmp.lt.u32.totalorder %s176_s14, %s321_s2 }
  0x27   :  { %p182_p4 = pnand %p180_p3, %p177_p2 }
  0x29   :  { %185 = shalt.err (!%p182_p4)
}
  0x2a   :  { %s186_s20 = scalar_lea.vmem %s41_s11, 256  ;;  %p191_p6 = scmp.lt.s32.totalorder %s41_s11, %s41_s11 }
  0x2b   :  { %p187_p5 = scmp.ne.s32.totalorder %s41_s11, %s186_s20  ;;  %p192_p7 = scmp.lt.s32.totalorder %s186_s20, %s186_s20 }
  0x2d   :  { %p193_p8 = por %p192_p7, %p191_p6 }
  0x2f   :  { %p194_p9 = pnand %p193_p8, %p187_p5 }
  0x31   :  { %197 = shalt.err (!%p194_p9)
}
  0x32   :  { %46 = dma.hbm_to_vmem [thread:$0]  %s321_s2, 256, %s41_s11, [#allocation6], %s228_s24, %s228_s24, %s229_s25  }
  0x33   :  { %220 = dma.done.wait [#allocation3], 256  }
  0x34   :  { %221 = vsyncadd [#allocation3], 4294967040 }
  0x35   :  { %222 = dma.done.wait [#allocation6], 512  }
  0x36   :  { %223 = vsyncadd [#allocation6], 4294966784  ;;  %v56_v0 = vld [vmem:[#allocation2] sm:$0xff]  ;;  %v57_v2 = vld [vmem:[#allocation2 + $0x8] sm:$0xff]  ;;  %s231_s2 = smov [#allocation8]  }
  0x37   :  { %v68_v1 = vand.u32 2147483647, %v56_v0  ;;  %v69_v3 = vand.u32 2147483647, %v57_v2  ;;  %v58_v14 = vld [vmem:[#allocation5] sm:$0xff]  ;;  %v59_v15 = vld [vmem:[#allocation5 + $0x8] sm:$0xff] }
  0x38   :  { %v62_v17 = vmax.f32 %v56_v0, 0.0  ;;  %v64_v18 = vmul.f32 %v58_v14, %v56_v0  ;;  %v63_v21 = vmax.f32 %v57_v2, 0.0  ;;  %v65_v22 = vmul.f32 %v59_v15, %v57_v2  ;;  %v60_v32 = vld [vmem:[#allocation7] sm:$0xff]  ;;  %v61_v35 = vld [vmem:[#allocation7 + $0x8] sm:$0xff]  ;;  %s105_s21 = sshll.u32 %s231_s2, 4  ;;  %s106_s21 = int_to_ptr.vmem [resolvable:$true] %s105_s21 }
  0x39   :  { %v70_v4 = vsub.f32 0.0, %v68_v1  ;;  %v71_v5 = vsub.f32 0.0, %v69_v3  ;;  %s198_s22 = scalar_lea.vmem %s106_s21, 256  ;;  %p203_p11 = scmp.lt.s32.totalorder %s106_s21, %s106_s21 }
  0x3a   :  { %v66_v26 = vsub.f32 %v62_v17, %v64_v18  ;;  %v67_v30 = vsub.f32 %v63_v21, %v65_v22  ;;  %p199_p10 = scmp.ne.s32.totalorder %s106_s21, %s198_s22  ;;  %p204_p12 = scmp.lt.s32.totalorder %s198_s22, %s198_s22 }
  0x3b   :  { %v72_v6 = vmul.f32 1.442695, %v70_v4  ;;  %v74_v7 = vmul.f32 1.442695, %v71_v5 }
  0x3c   :  { %p205_p13 = por %p204_p12, %p203_p11 }
  0x3d   :  { %124 = vpow2.f32 %v72_v6 }
  0x3e   :  { %126 = vpow2.f32 %v74_v7  ;;  %p206_p0 = pnand %p205_p13, %p199_p10 }
  0x47   :  { %v125_v8 = vpop.eup %124 }
  0x48   :  { %v127_v9 = vpop.eup %126  ;;  %v76_v10 = vadd.f32 1.0, %v125_v8  ;;  %v79_v12 = vmul.f32 -0.5, %v125_v8  ;;  %v82_v19 = vand.u32 2147483647, %v125_v8 }
  0x49   :  { %v85_v11 = vadd.f32 1.0, %v127_v9  ;;  %v88_v13 = vmul.f32 -0.5, %v127_v9  ;;  %v91_v23 = vand.u32 2147483647, %v127_v9 }
  0x4a   :  { %128 = vlog2.f32 %v76_v10  ;;  %v80_v16 = vadd.f32 1.0, %v79_v12  ;;  %vm83_vm0 = vcmp.lt.f32.partialorder %v82_v19, 0.0004427343 }
  0x4b   :  { %130 = vlog2.f32 %v85_v11  ;;  %v89_v20 = vadd.f32 1.0, %v88_v13  ;;  %vm92_vm1 = vcmp.lt.f32.partialorder %v91_v23, 0.0004427343 }
  0x4c   :  { %v81_v24 = vmul.f32 %v125_v8, %v80_v16 }
  0x4d   :  { %v90_v27 = vmul.f32 %v127_v9, %v89_v20 }
  0x54   :  { %v129_v25 = vpop.eup %128 }
  0x55   :  { %v131_v28 = vpop.eup %130  ;;  %v78_v29 = vmul.f32 0.6931472, %v129_v25 }
  0x56   :  { %v87_v31 = vmul.f32 0.6931472, %v131_v28 }
  0x57   :  { %v84_v33 = vsel %vm83_vm0, %v81_v24, %v78_v29 }
  0x58   :  { %v94_v34 = vadd.f32 %v84_v33, %v66_v26  ;;  %v93_v36 = vsel %vm92_vm1, %v90_v27, %v87_v31 }
  0x59   :  { %v95_v37 = vadd.f32 %v93_v36, %v67_v30 }
  0x5a   :  { %v96_v38 = vmul.f32 %v94_v34, %v60_v32 }
  0x5b   :  { %v97_v39 = vmul.f32 %v95_v37, %v61_v35 }
  0x5c   :  { %98 = vst [vmem:[#allocation8] sm:$0xff] %v96_v38 }
  0x5d   :  { %99 = vst [vmem:[#allocation8 + $0x8] sm:$0xff] %v97_v39 }
  0x5e   :  { %209 = shalt.err (!%p206_p0)
}
  0x5f   :  { %s210_s27 = scalar_lea.hbm %s322_s3, 256 }
  0x60   :  { %p211_p1 = scmp.ne.s32.totalorder %s322_s3, %s210_s27  ;;  %p214_p2 = scmp.lt.u32.totalorder %s210_s27, %s322_s3 }
  0x62   :  { %p216_p3 = pnand %p214_p2, %p211_p1 }
  0x64   :  { %219 = shalt.err (!%p216_p3)
}
  0x65   :  { %111 = dma.vmem_to_hbm [thread:$0]  %s106_s21, 256, %s322_s3, [#allocation4], %s228_s24, %s228_s24, %s229_s25  }
  0x66   :  { %224 = dma.done.wait [#allocation4], 256  }
  0x67   :  { %225 = vsyncadd [#allocation4], 4294967040 }
  0x68   :  { %115 = vsyncpa [#allocation3], 1 }
  0x69   :  { %116 = vsyncpa [#allocation6], 1 }
  0x6a   :  { %117 = vsyncpa [#allocation4], 1 }

</bundles_post_ra>
